<compile_context>
chip_gen: v7x
topology: tpu7x:2x2x1
jax: 0.10.0
libtpu: 0.0.40
codegen_flags: <defaults>
</compile_context>

<pallas_src>
import functools

import jax
import jax.numpy as jnp
from jax.experimental import pallas as pl
from jax.experimental.pallas import tpu as pltpu


def _round_up(x, m):
    return ((x + m - 1) // m) * m


def _make_stats_kernel(single_l_step, sig_length, lane_tile):
    """Builds the per-row statistics kernel.

    Outputs (per (TB, 1) block, f32): rowdot_xy, rowdot_xx, rowdot_yy,
    rowsum_x, rowsum_y.
    """

    def kernel(x_ref, y_ref, sxy_ref, sxx_ref, syy_ref, sx_ref, sy_ref):
        x = x_ref[...].astype(jnp.float32)
        y = y_ref[...].astype(jnp.float32)

        if single_l_step:
            # One lane tile spans the whole signal: write stats exactly once,
            # no accumulator init / read-modify-write needed.
            sxy_ref[...] = jnp.sum(x * y, axis=1, keepdims=True)
            sxx_ref[...] = jnp.sum(x * x, axis=1, keepdims=True)
            syy_ref[...] = jnp.sum(y * y, axis=1, keepdims=True)
            sx_ref[...] = jnp.sum(x, axis=1, keepdims=True)
            sy_ref[...] = jnp.sum(y, axis=1, keepdims=True)
        else:
            k = pl.program_id(1)

            @pl.when(k == 0)
            def _():
                sxy_ref[...] = jnp.zeros_like(sxy_ref)
                sxx_ref[...] = jnp.zeros_like(sxx_ref)
                syy_ref[...] = jnp.zeros_like(syy_ref)
                sx_ref[...] = jnp.zeros_like(sx_ref)
                sy_ref[...] = jnp.zeros_like(sy_ref)

            if sig_length % lane_tile != 0:
                # Mask the lane tail once on x and y (garbage lanes in the
                # trailing partial lane block would otherwise corrupt real
                # rows' sums).  Non-tail tiles compare against >= lane_tile,
                # so everything stays valid there.
                lane = jax.lax.broadcasted_iota(jnp.int32, x.shape, 1)
                valid = lane < (sig_length - k * lane_tile)
                x = jnp.where(valid, x, 0.0)
                y = jnp.where(valid, y, 0.0)

            sxy_ref[...] += jnp.sum(x * y, axis=1, keepdims=True)
            sxx_ref[...] += jnp.sum(x * x, axis=1, keepdims=True)
            syy_ref[...] += jnp.sum(y * y, axis=1, keepdims=True)
            sx_ref[...] += jnp.sum(x, axis=1, keepdims=True)
            sy_ref[...] += jnp.sum(y, axis=1, keepdims=True)

    return kernel


def _tiling(BR, sig_length, lane_tile_cap):
    """Choose (TB, TL, row_tiles, l_tiles) without any input padding."""
    SUB = 8
    # ~2.5 MiB f32 per tile per input; 2 inputs x <=3 pipeline buffers
    # stays <= ~16 MiB of input buffering (fits v5e/v6e/v7x budgets).
    MAX_TILE_ELEMS = 640 * 1024

    lane_tile_cap = max(128, (lane_tile_cap // 128) * 128)
    if sig_length <= lane_tile_cap:
        TL = sig_length          # full-dim lane block: single reduction step
        l_tiles = 1
    else:
        TL = lane_tile_cap       # multiple of 128; tail masked in-kernel
        l_tiles = pl.cdiv(sig_length, TL)

    TB_cap = max(SUB, min(512, (MAX_TILE_ELEMS // TL) // SUB * SUB))
    if BR <= TB_cap:
        TB = BR                  # single row tile, full-dim block (always legal)
        row_tiles = 1
    else:
        row_tiles = pl.cdiv(BR, TB_cap)
        if row_tiles % 2:        # balance across v7x's two TensorCores
            row_tiles += 1
        TB = _round_up(pl.cdiv(BR, row_tiles), SUB)
        row_tiles = pl.cdiv(BR, TB)
    return TB, TL, row_tiles, l_tiles


@functools.partial(jax.jit, static_argnames=("lane_tile_cap",))
def correlation_loss(Z_est, Z_gt, *, lane_tile_cap=4096):
    """Pallas implementation of CorrelationLoss.forward.

    Args:
        Z_est: (bs, region, sig_length) array.
        Z_gt:  (bs, region, sig_length) array.
        lane_tile_cap: max lane-tile size; signals longer than this are tiled
            along the reduction axis (with in-kernel tail masking).
    Returns:
        scalar float32 loss, semantically identical to the PyTorch module
        (including its global-vs-per-row sum mixing and NaN for constant rows).
    """
    assert Z_est.shape == Z_gt.shape
    bs, region, sig_length = Z_est.shape
    BR = bs * region

    x = Z_est.reshape(BR, sig_length)
    y = Z_gt.reshape(BR, sig_length)

    TB, TL, row_tiles, l_tiles = _tiling(BR, sig_length, lane_tile_cap)
    single_l = l_tiles == 1
    n_steps = row_tiles * l_tiles

    if single_l:
        grid = (row_tiles,)
        in_map = lambda i: (i, 0)
        out_map = lambda i: (i, 0)
        dims = ("parallel",)
    else:
        grid = (row_tiles, l_tiles)           # reduction axis last
        in_map = lambda i, k: (i, k)
        out_map = lambda i, k: (i, 0)         # resident accumulator across k
        dims = ("parallel", "arbitrary")

    # Deeper input pipelining only when there are enough grid steps to hide
    # DMA-issue gaps; keeps VMEM footprint minimal for tiny problems.
    if n_steps >= 3:
        in_spec = pl.BlockSpec((TB, TL), in_map, pipeline_mode=pl.Buffered(3))
    else:
        in_spec = pl.BlockSpec((TB, TL), in_map)
    # NOTE: (TB, 1) output blocks are written back at most once per row tile,
    # so the masked narrow store is negligible vs. input streaming.
    out_spec = pl.BlockSpec((TB, 1), out_map)
    stat_shape = jax.ShapeDtypeStruct((BR, 1), jnp.float32)

    kernel = _make_stats_kernel(single_l, sig_length, TL)

    sxy, sxx, syy, sx, sy = pl.pallas_call(
        kernel,
        out_shape=(stat_shape,) * 5,
        grid_spec=pltpu.PrefetchScalarGridSpec(
            num_scalar_prefetch=0,
            grid=grid,
            in_specs=[in_spec, in_spec],
            out_specs=(out_spec,) * 5,
        ),
        compiler_params=pltpu.CompilerParams(
            dimension_semantics=dims,
            vmem_limit_bytes=32 * 1024 * 1024,
        ),
    )(x, y)

    # ---- Finalize: O(bs*region) work, plain JAX. ----
    sxy = sxy[:, 0]
    sxx = sxx[:, 0]
    syy = syy[:, 0]
    sx = sx[:, 0]
    sy = sy[:, 0]

    # torch.sum with no dim (global scalar) == sum over rows of the row-dots.
    S_xy = jnp.sum(sxy)
    S_xx = jnp.sum(sxx)
    S_yy = jnp.sum(syy)

    L = jnp.float32(sig_length)
    numerator = L * S_xy - sx * sy
    denominator1 = L * S_xx - sx * sx
    denominator2 = L * S_yy - sy * sy
    corr_loss = 1.0 - numerator / jnp.sqrt(denominator1 * denominator2)
    # NOTE: denominator <= 0 for (near-)constant signals gives NaN/Inf, exactly
    # matching the PyTorch module (no guard added intentionally).
    return jnp.sum(corr_loss)


def _reference(Z_est, Z_gt):
    # Pure-JAX mirror of the PyTorch code, for correctness checking.
    bs, region, sig_length = Z_est.shape
    Z_est = Z_est.astype(jnp.float32)
    Z_gt = Z_gt.astype(jnp.float32)
    numerator = sig_length * jnp.sum(Z_est * Z_gt) - jnp.sum(Z_est, axis=2) * jnp.sum(Z_gt, axis=2)
    d1 = sig_length * jnp.sum(Z_est * Z_est) - jnp.sum(Z_est, axis=2) * jnp.sum(Z_est, axis=2)
    d2 = sig_length * jnp.sum(Z_gt * Z_gt) - jnp.sum(Z_gt, axis=2) * jnp.sum(Z_gt, axis=2)
    corr_loss = 1.0 - numerator / jnp.sqrt(d1 * d2)
    return jnp.sum(corr_loss)


if __name__ == "__main__":
    key = jax.random.PRNGKey(0)

    # Case 1: tiny module-spec shape -> single grid step, full-dim blocks.
    # Case 2: BR=640, sig_length=1500 -> two *balanced* row tiles (320 each),
    #         single reduction step with a full-length (non-128-multiple) lane
    #         block, no padding anywhere.
    # Case 3: small lane_tile_cap forces the tiled-reduction path: L-axis
    #         accumulation, lane-tail masking, and Buffered(3) pipelining.
    cases = [
        ((2, 4, 8), 4096),
        ((4, 160, 1500), 4096),
        ((2, 12, 1500), 512),
    ]
    for idx, (shape, cap) in enumerate(cases):
        k1, k2, key = jax.random.split(key, 3)
        Z_est = jax.random.normal(k1, shape, dtype=jnp.float32)
        Z_gt = jax.random.normal(k2, shape, dtype=jnp.float32)

        loss = correlation_loss(Z_est, Z_gt, lane_tile_cap=cap)
        jax.block_until_ready(loss)

        ref = _reference(Z_est, Z_gt)
        assert bool(jnp.isfinite(loss)), (idx, loss)
        assert jnp.allclose(loss, ref, rtol=1e-4, atol=1e-4), (idx, loss, ref)

    print("KERNEL_OK")
</pallas_src>

<mosaic_0001>
module attributes {stable_mosaic.version = 11 : i64} {
  func.func @kernel(%arg0: i32, %arg1: memref<8x8xf32, #tpu.memory_space<vmem>>, %arg2: memref<8x8xf32, #tpu.memory_space<vmem>>, %arg3: memref<8x1xf32, #tpu.memory_space<vmem>>, %arg4: memref<8x1xf32, #tpu.memory_space<vmem>>, %arg5: memref<8x1xf32, #tpu.memory_space<vmem>>, %arg6: memref<8x1xf32, #tpu.memory_space<vmem>>, %arg7: memref<8x1xf32, #tpu.memory_space<vmem>>) attributes {dimension_semantics = [#tpu.dimension_semantics<parallel>], iteration_bounds = array<i64: 1>, scalar_prefetch = 0 : i64, scratch_operands = 0 : i64, tpu.core_type = #tpu.core_type<tc>, window_params = [{transform_indices = @transform_0, window_bounds = array<i64: 8, 8>}, {transform_indices = @transform_1, window_bounds = array<i64: 8, 8>}, {transform_indices = @transform_2, window_bounds = array<i64: 8, 1>}, {transform_indices = @transform_3, window_bounds = array<i64: 8, 1>}, {transform_indices = @transform_4, window_bounds = array<i64: 8, 1>}, {transform_indices = @transform_5, window_bounds = array<i64: 8, 1>}, {transform_indices = @transform_6, window_bounds = array<i64: 8, 1>}]} {
    %c0 = arith.constant 0 : index
    %c0_0 = arith.constant 0 : index
    %0 = vector.load %arg1[%c0, %c0_0] : memref<8x8xf32, #tpu.memory_space<vmem>>, vector<8x8xf32>
    %c0_1 = arith.constant 0 : index
    %c0_2 = arith.constant 0 : index
    %1 = vector.load %arg2[%c0_1, %c0_2] : memref<8x8xf32, #tpu.memory_space<vmem>>, vector<8x8xf32>
    %2 = arith.mulf %0, %1 : vector<8x8xf32>
    %cst = arith.constant dense<0.000000e+00> : vector<8xf32>
    %3 = vector.multi_reduction <add>, %2, %cst [1] : vector<8x8xf32> to vector<8xf32>
    %4 = vector.shape_cast %3 : vector<8xf32> to vector<8x1xf32>
    %c0_3 = arith.constant 0 : index
    %c0_4 = arith.constant 0 : index
    %5 = vector.load %arg3[%c0_3, %c0_4] : memref<8x1xf32, #tpu.memory_space<vmem>>, vector<8x1xf32>
    tpu.vector_store %arg3[%c0_3, %c0_4], %4 {strides = array<i32>} : memref<8x1xf32, #tpu.memory_space<vmem>>, vector<8x1xf32>,
    %6 = arith.mulf %0, %0 : vector<8x8xf32>
    %cst_5 = arith.constant dense<0.000000e+00> : vector<8xf32>
    %7 = vector.multi_reduction <add>, %6, %cst_5 [1] : vector<8x8xf32> to vector<8xf32>
    %8 = vector.shape_cast %7 : vector<8xf32> to vector<8x1xf32>
    %c0_6 = arith.constant 0 : index
    %c0_7 = arith.constant 0 : index
    %9 = vector.load %arg4[%c0_6, %c0_7] : memref<8x1xf32, #tpu.memory_space<vmem>>, vector<8x1xf32>
    tpu.vector_store %arg4[%c0_6, %c0_7], %8 {strides = array<i32>} : memref<8x1xf32, #tpu.memory_space<vmem>>, vector<8x1xf32>,
    %10 = arith.mulf %1, %1 : vector<8x8xf32>
    %cst_8 = arith.constant dense<0.000000e+00> : vector<8xf32>
    %11 = vector.multi_reduction <add>, %10, %cst_8 [1] : vector<8x8xf32> to vector<8xf32>
    %12 = vector.shape_cast %11 : vector<8xf32> to vector<8x1xf32>
    %c0_9 = arith.constant 0 : index
    %c0_10 = arith.constant 0 : index
    %13 = vector.load %arg5[%c0_9, %c0_10] : memref<8x1xf32, #tpu.memory_space<vmem>>, vector<8x1xf32>
    tpu.vector_store %arg5[%c0_9, %c0_10], %12 {strides = array<i32>} : memref<8x1xf32, #tpu.memory_space<vmem>>, vector<8x1xf32>,
    %cst_11 = arith.constant dense<0.000000e+00> : vector<8xf32>
    %14 = vector.multi_reduction <add>, %0, %cst_11 [1] : vector<8x8xf32> to vector<8xf32>
    %15 = vector.shape_cast %14 : vector<8xf32> to vector<8x1xf32>
    %c0_12 = arith.constant 0 : index
    %c0_13 = arith.constant 0 : index
    %16 = vector.load %arg6[%c0_12, %c0_13] : memref<8x1xf32, #tpu.memory_space<vmem>>, vector<8x1xf32>
    tpu.vector_store %arg6[%c0_12, %c0_13], %15 {strides = array<i32>} : memref<8x1xf32, #tpu.memory_space<vmem>>, vector<8x1xf32>,
    %cst_14 = arith.constant dense<0.000000e+00> : vector<8xf32>
    %17 = vector.multi_reduction <add>, %1, %cst_14 [1] : vector<8x8xf32> to vector<8xf32>
    %18 = vector.shape_cast %17 : vector<8xf32> to vector<8x1xf32>
    %c0_15 = arith.constant 0 : index
    %c0_16 = arith.constant 0 : index
    %19 = vector.load %arg7[%c0_15, %c0_16] : memref<8x1xf32, #tpu.memory_space<vmem>>, vector<8x1xf32>
    tpu.vector_store %arg7[%c0_15, %c0_16], %18 {strides = array<i32>} : memref<8x1xf32, #tpu.memory_space<vmem>>, vector<8x1xf32>,
    return
  }
  func.func @transform_0(%arg0: i32) -> (i32, i32) {
    %c0_i32 = arith.constant 0 : i32
    %c0_i32_0 = arith.constant 0 : i32
    return %arg0, %c0_i32 : i32, i32
  }
  func.func @transform_1(%arg0: i32) -> (i32, i32) {
    %c0_i32 = arith.constant 0 : i32
    %c0_i32_0 = arith.constant 0 : i32
    return %arg0, %c0_i32 : i32, i32
  }
  func.func @transform_2(%arg0: i32) -> (i32, i32) {
    %c0_i32 = arith.constant 0 : i32
    %c0_i32_0 = arith.constant 0 : i32
    return %arg0, %c0_i32 : i32, i32
  }
  func.func @transform_3(%arg0: i32) -> (i32, i32) {
    %c0_i32 = arith.constant 0 : i32
    %c0_i32_0 = arith.constant 0 : i32
    return %arg0, %c0_i32 : i32, i32
  }
  func.func @transform_4(%arg0: i32) -> (i32, i32) {
    %c0_i32 = arith.constant 0 : i32
    %c0_i32_0 = arith.constant 0 : i32
    return %arg0, %c0_i32 : i32, i32
  }
  func.func @transform_5(%arg0: i32) -> (i32, i32) {
    %c0_i32 = arith.constant 0 : i32
    %c0_i32_0 = arith.constant 0 : i32
    return %arg0, %c0_i32 : i32, i32
  }
  func.func @transform_6(%arg0: i32) -> (i32, i32) {
    %c0_i32 = arith.constant 0 : i32
    %c0_i32_0 = arith.constant 0 : i32
    return %arg0, %c0_i32 : i32, i32
  }
}

</mosaic_0001>

<bundles_post_ra>
// kernel: correlation_loss.1
= control target key start
LH: loop header
LB: loop body
LE: loop exit
PB: predicated region body
PF: predicated region fallthrough
CT: control target
= control target key end

     0   :  { %12 = vsyncpa [#allocation3], 0  ;;  %s101_s21 = smov [#allocation2]   ;;  %s167_s0 = inlined_call_operand.hbm [shape: f32[8,8], index: 0, kind: input, shape index: {}]   ;;  %s168_s1 = inlined_call_operand.vmem [shape: f32[8,8], index: 1, kind: input, shape index: {}]   ;;  %s169_s2 = inlined_call_operand.vmem [shape: f32[8,1], index: 2, kind: output, shape index: {0}]   ;;  %s170_s3 = inlined_call_operand.vmem [shape: f32[8,1], index: 3, kind: output, shape index: {1}]   ;;  %s171_s4 = inlined_call_operand.vmem [shape: f32[8,1], index: 4, kind: output, shape index: {2}]   ;;  %s172_s5 = inlined_call_operand.vmem [shape: f32[8,1], index: 5, kind: output, shape index: {3}]   ;;  %s173_s6 = inlined_call_operand.vmem [shape: f32[8,1], index: 6, kind: output, shape index: {4}]  }
   0x1   :  { %s19_s22 = sshll.u32 %s101_s21, 4  ;;  %s77_s25 = scalar_lea.hbm %s167_s0, 128  ;;  %s20_s22 = int_to_ptr.vmem [resolvable:$true] %s19_s22 }
   0x2   :  { %p78_p0 = scmp.ne.s32.totalorder %s167_s0, %s77_s25  ;;  %p81_p1 = scmp.lt.u32.totalorder %s77_s25, %s167_s0 }
   0x4   :  { %p83_p2 = pnand %p81_p1, %p78_p0 }
   0x6   :  { %86 = shalt.err (!%p83_p2)
}
   0x7   :  { %s87_s30 = scalar_lea.vmem %s20_s22, 128  ;;  %p92_p4 = scmp.lt.s32.totalorder %s20_s22, %s20_s22 }
   0x8   :  { %p88_p3 = scmp.ne.s32.totalorder %s20_s22, %s87_s30  ;;  %p93_p5 = scmp.lt.s32.totalorder %s87_s30, %s87_s30 }
   0xa   :  { %p94_p6 = por %p93_p5, %p92_p4 }
   0xc   :  { %p95_p7 = pnand %p94_p6, %p88_p3 }
   0xe   :  { %98 = shalt.err (!%p95_p7)
}
   0xf   :  { %22 = dma.hbm_to_vmem [thread:$0]  %s167_s0, 128, %s20_s22, [#allocation3]  }
  0x10   :  { %99 = dma.done.wait [#allocation3], 128  }
  0x11   :  { %100 = vsyncadd [#allocation3], 4294967168  ;;  %v28_v0 = vld [vmem:[#allocation2] sm:$0xff]  ;;  %vm31_vm0 = vcmask 64512   ;;  %vm35_vm1 = vcmask 7168  }
  0x12   :  { %v29_v1 = vld [vmem:[%s168_s1] sm:$0xff]  ;;  %v37_v4 = vmul.f32 %v28_v0, %v28_v0  ;;  %v47_v8 = vsel %vm31_vm0, %v28_v0, 0.0 }
  0x13   :  { %v30_v2 = vmul.f32 %v29_v1, %v28_v0  ;;  %v42_v3 = vmul.f32 %v29_v1, %v29_v1  ;;  %v51_v9 = vsel %vm31_vm0, %v29_v1, 0.0 }
  0x14   :  { %v38_v7 = vsel %vm31_vm0, %v37_v4, 0.0 }
  0x15   :  { %v32_v5 = vsel %vm31_vm0, %v30_v2, 0.0  ;;  %v43_v6 = vsel %vm31_vm0, %v42_v3, 0.0 }
  0x16   :  { %33 = vadd.xlane.f32.xlu0 %v32_v5  ;;  %44 = vadd.xlane.f32.xlu1 %v43_v6 }
  0x1a   :  { %39 = vadd.xlane.f32.xlu0 %v38_v7  ;;  %48 = vadd.xlane.f32.xlu1 %v47_v8 }
  0x1e   :  { %52 = vadd.xlane.f32.xlu0 %v51_v9 }
  0xa3   :  { %v34_v10 = vpop.xlane.xlu0 %33  ;;  %v45_v11 = vpop.xlane.xlu1 %44 }
  0xa4   :  { %36 = vst.msk [vmem:[%s169_s2] sm:$0xff] %vm35_vm1, %v34_v10  ;;  %46 = vst.msk [vmem:[%s171_s4] sm:$0xff] %vm35_vm1, %v45_v11 }
  0xa7   :  { %v40_v12 = vpop.xlane.xlu0 %39  ;;  %v49_v13 = vpop.xlane.xlu1 %48 }
  0xa8   :  { %41 = vst.msk [vmem:[%s170_s3] sm:$0xff] %vm35_vm1, %v40_v12  ;;  %50 = vst.msk [vmem:[%s172_s5] sm:$0xff] %vm35_vm1, %v49_v13 }
  0xab   :  { %v53_v14 = vpop.xlane.xlu0 %52 }
  0xac   :  { %54 = vst.msk [vmem:[%s173_s6] sm:$0xff] %vm35_vm1, %v53_v14 }
  0xad   :  { %75 = vsyncpa [#allocation3], 1 }

</bundles_post_ra>
